<compile_context>
chip_gen: v5e
topology: v5e:2x2
jax: 0.10.0
libtpu: 0.0.40
codegen_flags: <defaults>
</compile_context>

<pallas_src>
import functools

import jax
import jax.numpy as jnp
from jax import lax
from jax.experimental import pallas as pl
from jax.experimental.pallas import tpu as pltpu

EPS = 1e-12
LANE = 128
SUBLANE = 8


def _round_up(x, m):
    return ((x + m - 1) // m) * m


def _is_div_kernel(x_ref, t_ref, o_ref, acc_ref, *, eps, ts, half_s, s_rows,
                   needs_mask, approx_recip, unroll):
    j = pl.program_id(2)

    # Reduction (feature) axis is the last grid axis: init accumulator there.
    @pl.when(j == 0)
    def _():
        acc_ref[...] = jnp.zeros_like(acc_ref)

    # Global feature-block index (split axis 0 offsets it; may exceed the real
    # block count for the clamped tail of an odd split -> fully masked below).
    g = pl.program_id(0) * half_s + j

    n_full = ts // SUBLANE
    rem = ts % SUBLANE

    def chunk_loss(r0, rows, apply_mask):
        x = x_ref[:, pl.ds(r0, rows), :].astype(jnp.float32)
        t = t_ref[:, pl.ds(r0, rows), :].astype(jnp.float32)
        if apply_mask:
            # Row-granular validity mask against the true (128-lane) row count.
            gr = g * ts + r0 + lax.broadcasted_iota(jnp.int32, (rows, LANE), 0)
            valid = gr < s_rows
            # Masked rows -> x = t = 1 -> ratio = 1 -> loss = 0 exactly (and no
            # NaN/Inf from unspecified out-of-bounds data).
            x = jnp.where(valid, x, 1.0)
            t = jnp.where(valid, t, 1.0)
        num = t + eps
        den = x + eps
        if approx_recip:
            ratio = num * pl.reciprocal(den, approx=True)   # EUP slot
        else:
            ratio = num / den                               # exact divide
        return ratio - jnp.log(ratio) - 1.0

    def accumulate(masked):
        if n_full > 0:
            def body(c, carry):
                r0 = pl.multiple_of(c * SUBLANE, SUBLANE)
                acc_ref[...] += chunk_loss(r0, SUBLANE, masked)
                return carry

            lax.fori_loop(0, n_full, body, 0, unroll=min(unroll, n_full))
        if rem:
            # Only reachable when the whole feature dim fits one (unmasked)
            # block whose row count is not a multiple of 8.
            acc_ref[:, :rem, :] += chunk_loss(n_full * SUBLANE, rem, masked)

    if needs_mask:
        clean = (g + 1) * ts <= s_rows

        @pl.when(clean)
        def _():
            accumulate(masked=False)

        @pl.when(jnp.logical_not(clean))
        def _():
            accumulate(masked=True)
    else:
        accumulate(masked=False)

    # Finalize on the last reduction step: single cross-sublane reduce.
    @pl.when(j == pl.num_programs(2) - 1)
    def _():
        o_ref[0] = jnp.sum(acc_ref[...], axis=1)   # (tb, 128)


def is_divergence_loss(x, t, *, reduction="sum", eps=EPS, batch_mean=True,
                       target_block_bytes=4 * 1024 * 1024,
                       vmem_limit_bytes=48 * 1024 * 1024,
                       approx_reciprocal=False):
    """Matches ISdivergence.forward semantics.

    x, t: (B, *) arrays of identical shape.
    Returns a scalar if batch_mean else a (B,) array (float32).
    """
    assert x.shape == t.shape
    B = x.shape[0]
    F = 1
    for d in x.shape[1:]:
        F *= d

    x2 = x.reshape(B, F)
    t2 = t.reshape(B, F)

    itemsize = jnp.dtype(x.dtype).itemsize
    # Sublane granularity for packed dtypes (f32 -> 8, bf16 -> 16, int8 -> 32).
    sub = max(SUBLANE, 32 // itemsize)

    # Minimal feature padding: only to the next 128-lane row, and only when
    # needed (zero padding contributes exactly 0 loss for IS divergence).
    F_pad = _round_up(F, LANE)
    if F_pad != F:
        # TODO(synk): a 2-D (B, F) fallback would avoid this copy for
        # lane-misaligned feature counts.
        x2 = jnp.pad(x2, ((0, 0), (0, F_pad - F)))
        t2 = jnp.pad(t2, ((0, 0), (0, F_pad - F)))
    S = F_pad // LANE                       # rows of 128 lanes (true row count)

    x3 = x2.reshape(B, S, LANE)
    t3 = t2.reshape(B, S, LANE)

    # Batch tile: no padding; a ragged last batch tile only produces per-row
    # garbage in rows that are never written back.
    tb = min(B, SUBLANE)
    grid_b = pl.cdiv(B, tb)

    # Feature tiling: aim for ~target_block_bytes per input block.
    row_bytes = tb * LANE * itemsize
    ts_target = max(sub, (target_block_bytes // row_bytes) // sub * sub)
    ts = S if S <= ts_target else ts_target
    grid_s = pl.cdiv(S, ts)

    # Split the reduction across two partial outputs when the batch grid can't
    # feed two TensorCores (v7x); harmless (size-1 axis) elsewhere.
    n_split = 2 if (grid_b < 2 and grid_s >= 2) else 1
    half_s = pl.cdiv(grid_s, n_split)

    needs_mask = (S % ts != 0) or (n_split * half_s != grid_s)
    if needs_mask:
        assert ts % SUBLANE == 0

    kernel = functools.partial(
        _is_div_kernel, eps=eps, ts=ts, half_s=half_s, s_rows=S,
        needs_mask=needs_mask, approx_recip=approx_reciprocal, unroll=8)

    # Clamp so no block index maps fully past the array (the clamped tail of an
    # odd split is fully masked in-kernel, so it contributes exactly 0).
    in_map = lambda c, i, j: (i, jnp.minimum(c * half_s + j, grid_s - 1), 0)

    cost = pl.CostEstimate(
        flops=10 * B * F_pad,
        transcendentals=2 * B * F_pad,
        bytes_accessed=2 * B * F_pad * itemsize + n_split * B * LANE * 4)

    out = pl.pallas_call(
        kernel,
        out_shape=jax.ShapeDtypeStruct((n_split, B, LANE), jnp.float32),
        grid_spec=pltpu.PrefetchScalarGridSpec(
            num_scalar_prefetch=0,
            grid=(n_split, grid_b, half_s),
            in_specs=[
                pl.BlockSpec((tb, ts, LANE), in_map),
                pl.BlockSpec((tb, ts, LANE), in_map),
            ],
            out_specs=pl.BlockSpec((1, tb, LANE), lambda c, i, j: (c, i, 0)),
            scratch_shapes=[pltpu.VMEM((tb, SUBLANE, LANE), jnp.float32)],
        ),
        compiler_params=pltpu.CompilerParams(
            dimension_semantics=("parallel", "parallel", "arbitrary"),
            vmem_limit_bytes=vmem_limit_bytes,
        ),
        cost_estimate=cost,
    )(x3, t3)

    # Tiny (n_split, B, 128) partials: final reduce outside the kernel.
    per_batch = jnp.sum(out, axis=(0, 2))          # (B,)

    if reduction == "sum":
        loss = per_batch
    elif reduction == "mean":
        loss = per_batch / jnp.float32(F)
    else:
        raise NotImplementedError(f"Not support {reduction} for reduction")

    if batch_mean:
        loss = jnp.mean(loss, axis=0)
    return loss


def _reference(x, t, *, reduction="sum", eps=EPS, batch_mean=True):
    x = x.astype(jnp.float32)
    t = t.astype(jnp.float32)
    ratio = (t + eps) / (x + eps)
    loss = ratio - jnp.log(ratio) - 1.0
    dims = tuple(range(1, x.ndim))
    if reduction == "sum":
        loss = jnp.sum(loss, axis=dims)
    else:
        loss = jnp.mean(loss, axis=dims)
    if batch_mean:
        loss = jnp.mean(loss, axis=0)
    return loss


if __name__ == "__main__":
    key = jax.random.PRNGKey(0)
    k1, k2, k3, k4 = jax.random.split(key, 4)

    # Case 1: small NCHW-like input (batch=2, channels=4, H=W=16): features are
    # lane-aligned (F = 1024), so no padding / no copy path is exercised.
    shape = (2, 4, 16, 16)
    x = jax.random.uniform(k1, shape, dtype=jnp.float32, minval=0.01, maxval=1.0)
    t = jax.random.uniform(k2, shape, dtype=jnp.float32, minval=0.01, maxval=1.0)

    out_sum = is_divergence_loss(x, t, reduction="sum", batch_mean=True)
    out_mean = is_divergence_loss(x, t, reduction="mean", batch_mean=False)
    jax.block_until_ready((out_sum, out_mean))

    ref_sum = _reference(x, t, reduction="sum", batch_mean=True)
    ref_mean = _reference(x, t, reduction="mean", batch_mean=False)
    assert jnp.allclose(out_sum, ref_sum, rtol=1e-5, atol=1e-5), (out_sum, ref_sum)
    assert jnp.allclose(out_mean, ref_mean, rtol=1e-5, atol=1e-5), (out_mean, ref_mean)

    # Case 2: forces multiple ragged feature tiles + the dual-core feature
    # split (odd tile count -> clamped, fully-masked tail block).
    shape2 = (2, 37, 128)
    x2 = jax.random.uniform(k3, shape2, dtype=jnp.float32, minval=0.01, maxval=1.0)
    t2 = jax.random.uniform(k4, shape2, dtype=jnp.float32, minval=0.01, maxval=1.0)
    out2 = is_divergence_loss(x2, t2, reduction="sum", batch_mean=False,
                              target_block_bytes=8 * 1024)
    jax.block_until_ready(out2)
    ref2 = _reference(x2, t2, reduction="sum", batch_mean=False)
    assert jnp.allclose(out2, ref2, rtol=1e-5, atol=1e-5), (out2, ref2)

    print("KERNEL_OK")
</pallas_src>

<mosaic_0001>
module attributes {stable_mosaic.version = 11 : i64} {
  func.func @_is_div_kernel(%arg0: i32, %arg1: i32, %arg2: i32, %arg3: memref<2x8x128xf32, #tpu.memory_space<vmem>>, %arg4: memref<2x8x128xf32, #tpu.memory_space<vmem>>, %arg5: memref<1x2x128xf32, #tpu.memory_space<vmem>>, %arg6: memref<2x8x128xf32, #tpu.memory_space<vmem>>) attributes {dimension_semantics = [#tpu.dimension_semantics<parallel>, #tpu.dimension_semantics<parallel>, #tpu.dimension_semantics<arbitrary>], iteration_bounds = array<i64: 1, 1, 1>, scalar_prefetch = 0 : i64, scratch_operands = 1 : i64, tpu.core_type = #tpu.core_type<tc>, window_params = [{transform_indices = @transform_0, window_bounds = array<i64: 2, 8, 128>}, {transform_indices = @transform_1, window_bounds = array<i64: 2, 8, 128>}, {transform_indices = @transform_2, window_bounds = array<i64: 1, 2, 128>}]} {
    %c0_i32 = arith.constant 0 : i32
    %0 = arith.cmpi eq, %arg2, %c0_i32 : i32
    %1 = arith.extui %0 : i1 to i32
    %c0_i32_0 = arith.constant 0 : i32
    %2 = arith.cmpi ne, %1, %c0_i32_0 : i32
    scf.if %2 {
      %cst_15 = arith.constant 0.000000e+00 : f32
      %24 = vector.broadcast %cst_15 : f32 to vector<2x8x128xf32>
      %c0_16 = arith.constant 0 : index
      %c0_17 = arith.constant 0 : index
      %c0_18 = arith.constant 0 : index
      %25 = vector.load %arg6[%c0_16, %c0_17, %c0_18] : memref<2x8x128xf32, #tpu.memory_space<vmem>>, vector<2x8x128xf32>
      tpu.vector_store %arg6[%c0_16, %c0_17, %c0_18], %24 {strides = array<i32>} : memref<2x8x128xf32, #tpu.memory_space<vmem>>, vector<2x8x128xf32>,
    } else {
    }
    %c0_i32_1 = arith.constant 0 : i32
    %c8_i32 = arith.constant 8 : i32
    %3 = arith.muli %c0_i32_1, %c8_i32 : i32
    %4 = tpu.assume_multiple %3, 8 : i32
    %c0 = arith.constant 0 : index
    %c0_2 = arith.constant 0 : index
    %c0_3 = arith.constant 0 : index
    %5 = vector.load %arg6[%c0, %c0_2, %c0_3] : memref<2x8x128xf32, #tpu.memory_space<vmem>>, vector<2x8x128xf32>
    %c0_4 = arith.constant 0 : index
    %6 = arith.index_cast %4 : i32 to index
    %c0_5 = arith.constant 0 : index
    %7 = vector.load %arg3[%c0_4, %6, %c0_5] : memref<2x8x128xf32, #tpu.memory_space<vmem>>, vector<2x8x128xf32>
    %c0_6 = arith.constant 0 : index
    %8 = arith.index_cast %4 : i32 to index
    %c0_7 = arith.constant 0 : index
    %9 = vector.load %arg4[%c0_6, %8, %c0_7] : memref<2x8x128xf32, #tpu.memory_space<vmem>>, vector<2x8x128xf32>
    %cst = arith.constant 9.99999996E-13 : f32
    %10 = vector.broadcast %cst : f32 to vector<2x8x128xf32>
    %11 = arith.addf %9, %10 : vector<2x8x128xf32>
    %cst_8 = arith.constant 9.99999996E-13 : f32
    %12 = vector.broadcast %cst_8 : f32 to vector<2x8x128xf32>
    %13 = arith.addf %7, %12 : vector<2x8x128xf32>
    %14 = arith.divf %11, %13 : vector<2x8x128xf32>
    %15 = math.log %14 : vector<2x8x128xf32>
    %16 = arith.subf %14, %15 : vector<2x8x128xf32>
    %cst_9 = arith.constant 1.000000e+00 : f32
    %17 = vector.broadcast %cst_9 : f32 to vector<2x8x128xf32>
    %18 = arith.subf %16, %17 : vector<2x8x128xf32>
    %19 = arith.addf %5, %18 : vector<2x8x128xf32>
    %c0_10 = arith.constant 0 : index
    %c0_11 = arith.constant 0 : index
    %c0_12 = arith.constant 0 : index
    %20 = vector.load %arg6[%c0_10, %c0_11, %c0_12] : memref<2x8x128xf32, #tpu.memory_space<vmem>>, vector<2x8x128xf32>
    tpu.vector_store %arg6[%c0_10, %c0_11, %c0_12], %19 {strides = array<i32>} : memref<2x8x128xf32, #tpu.memory_space<vmem>>, vector<2x8x128xf32>,
    %c1_i32 = arith.constant 1 : i32
    %c0_i32_13 = arith.constant 0 : i32
    %21 = arith.cmpi eq, %arg2, %c0_i32_13 : i32
    %22 = arith.extui %21 : i1 to i32
    %c0_i32_14 = arith.constant 0 : i32
    %23 = arith.cmpi ne, %22, %c0_i32_14 : i32
    scf.if %23 {
      %c0_15 = arith.constant 0 : index
      %c0_16 = arith.constant 0 : index
      %c0_17 = arith.constant 0 : index
      %24 = vector.load %arg6[%c0_15, %c0_16, %c0_17] : memref<2x8x128xf32, #tpu.memory_space<vmem>>, vector<2x8x128xf32>
      %cst_18 = arith.constant dense<0.000000e+00> : vector<2x128xf32>
      %25 = vector.multi_reduction <add>, %24, %cst_18 [1] : vector<2x8x128xf32> to vector<2x128xf32>
      %c0_19 = arith.constant 0 : index
      %c0_20 = arith.constant 0 : index
      %c0_21 = arith.constant 0 : index
      %26 = vector.load %arg5[%c0_19, %c0_20, %c0_21] : memref<1x2x128xf32, #tpu.memory_space<vmem>>, vector<1x2x128xf32>
      %27 = vector.shape_cast %26 : vector<1x2x128xf32> to vector<2x128xf32>
      %28 = vector.shape_cast %25 : vector<2x128xf32> to vector<1x2x128xf32>
      tpu.vector_store %arg5[%c0_19, %c0_20, %c0_21], %28 {strides = array<i32>} : memref<1x2x128xf32, #tpu.memory_space<vmem>>, vector<1x2x128xf32>,
    } else {
    }
    return
  }
  func.func @transform_0(%arg0: i32, %arg1: i32, %arg2: i32) -> (i32, i32, i32) {
    %c1_i32 = arith.constant 1 : i32
    %0 = arith.muli %arg0, %c1_i32 : i32
    %1 = arith.addi %0, %arg2 : i32
    %c0_i32 = arith.constant 0 : i32
    %2 = arith.minsi %1, %c0_i32 : i32
    %c0_i32_0 = arith.constant 0 : i32
    %c0_i32_1 = arith.constant 0 : i32
    return %arg1, %2, %c0_i32_0 : i32, i32, i32
  }
  func.func @transform_1(%arg0: i32, %arg1: i32, %arg2: i32) -> (i32, i32, i32) {
    %c1_i32 = arith.constant 1 : i32
    %0 = arith.muli %arg0, %c1_i32 : i32
    %1 = arith.addi %0, %arg2 : i32
    %c0_i32 = arith.constant 0 : i32
    %2 = arith.minsi %1, %c0_i32 : i32
    %c0_i32_0 = arith.constant 0 : i32
    %c0_i32_1 = arith.constant 0 : i32
    return %arg1, %2, %c0_i32_0 : i32, i32, i32
  }
  func.func @transform_2(%arg0: i32, %arg1: i32, %arg2: i32) -> (i32, i32, i32) {
    %c0_i32 = arith.constant 0 : i32
    %c0_i32_0 = arith.constant 0 : i32
    return %arg0, %arg1, %c0_i32 : i32, i32, i32
  }
}

</mosaic_0001>

<bundles_post_ra>
// kernel: tpu_custom_call.1
= control target key start
LH: loop header
LB: loop body
LE: loop exit
PB: predicated region body
PF: predicated region fallthrough
CT: control target
= control target key end

     0   :  { %7 = vsyncpa [#allocation4], 0  ;;  %s285_s0 = inlined_call_operand.hbm [shape: f32[2,8,128], index: 0, kind: input, shape index: {}]   ;;  %s286_s1 = inlined_call_operand.hbm [shape: f32[2,8,128], index: 1, kind: input, shape index: {}]   ;;  %s287_s2 = inlined_call_operand.hbm [shape: f32[1,2,128], index: 2, kind: output, shape index: {}]  }
   0x1   :  { %8 = vsyncpa [#allocation7], 0 }
   0x2   :  { %9 = vsyncpa [#allocation5], 0  ;;  %s19_s11 = sshll.u32 %s285_s0, 4  ;;  %s256_s12 = smov [#allocation3]   ;;  %s20_s11 = int_to_ptr.hbm [resolvable:$true] %s19_s11 }
   0x3   :  { %s21_s13 = sshll.u32 %s256_s12, 4  ;;  %s37_s16 = sshll.u32 %s286_s1, 4  ;;  %s22_s13 = int_to_ptr.vmem [resolvable:$true] %s21_s13  ;;  %s38_s16 = int_to_ptr.hbm [resolvable:$true] %s37_s16 }
   0x4   :  { %s257_s17 = smov 128   ;;  %s258_s18 = smov 8  }
   0x5   :  { %27 = dma.hbm_to_vmem [thread:$0]  %s20_s11, 256, %s22_s13, [#allocation4], %s257_s17, %s257_s17, %s258_s18  }
   0x6   :  { %s259_s19 = smov [#allocation6]  }
   0x7   :  { %s39_s20 = sshll.u32 %s259_s19, 4  ;;  %s40_s20 = int_to_ptr.vmem [resolvable:$true] %s39_s20 }
   0x8   :  { %45 = dma.hbm_to_vmem [thread:$0]  %s38_s16, 256, %s40_s20, [#allocation7], %s257_s17, %s257_s17, %s258_s18  }
   0x9   :  { %250 = dma.done.wait [#allocation4], 256  }
   0xa   :  { %251 = vsyncadd [#allocation4], 4294967040 }
   0xb   :  { %252 = dma.done.wait [#allocation7], 256  }
   0xc   :  { %253 = vsyncadd [#allocation7], 4294967040  ;;  %v68_v0 = vld [vmem:[#allocation3] sm:$0xff]  ;;  %v69_v1 = vld [vmem:[#allocation3 + $0x8] sm:$0xff]  ;;  %s260_s0 = smov [#allocation8]   ;;  %s148_s23 = sshll.u32 %s287_s2, 4  ;;  %s149_s23 = int_to_ptr.hbm [resolvable:$true] %s148_s23 }
   0xd   :  { %v74_v2 = vadd.f32 1e-12, %v68_v0  ;;  %v75_v3 = vadd.f32 1e-12, %v69_v1  ;;  %v70_v12 = vld [vmem:[#allocation6] sm:$0xff]  ;;  %v71_v15 = vld [vmem:[#allocation6 + $0x8] sm:$0xff] }
   0xe   :  { %v72_v19 = vadd.f32 1e-12, %v70_v12  ;;  %v73_v22 = vadd.f32 1e-12, %v71_v15  ;;  %s146_s1 = sshll.u32 %s260_s0, 4  ;;  %vm137_vm8 = vcmask 1041409   ;;  %s147_s1 = int_to_ptr.vmem [resolvable:$true] %s146_s1 }
   0xf   :  { %170 = vrcp.f32 %v74_v2  ;;  %vm81_vm0 = vweird.f32 %v74_v2  ;;  %v87_v7 = vand.u32 2147483648, %v74_v2  ;;  %v85_v10 = vand.u32 2147483647, %v74_v2 }
  0x10   :  { %172 = vrcp.f32 %v75_v3  ;;  %v102_v11 = vand.u32 2147483648, %v75_v3  ;;  %vm96_vm2 = vweird.f32 %v75_v3  ;;  %v100_v14 = vand.u32 2147483647, %v75_v3 }
  0x11   :  { %v88_v17 = vor.u32 1.1754944e-38, %v87_v7  ;;  %vm86_vm5 = vcmp.eq.f32.partialorder %v85_v10, 8.507059e+37 }
  0x12   :  { %v103_v21 = vor.u32 1.1754944e-38, %v102_v11  ;;  %vm101_vm7 = vcmp.eq.f32.partialorder %v100_v14, 8.507059e+37 }
  0x15   :  { %v171_v4 = vpop.eup %170 }
  0x16   :  { %v173_v5 = vpop.eup %172  ;;  %v77_v6 = vmul.f32 %v171_v4, %v74_v2  ;;  %vm82_vm1 = vweird.f32 %v171_v4 }
  0x17   :  { %v92_v8 = vmul.f32 %v173_v5, %v75_v3  ;;  %vm97_vm3 = vweird.f32 %v173_v5  ;;  %vm83_vm4 = vmor %vm81_vm0, %vm82_vm1 }
  0x18   :  { %v78_v9 = vsub.f32 1.0, %v77_v6  ;;  %vm98_vm6 = vmor %vm96_vm2, %vm97_vm3 }
  0x19   :  { %v93_v13 = vsub.f32 1.0, %v92_v8 }
  0x1a   :  { %v79_v16 = vmul.f32 %v171_v4, %v78_v9 }
  0x1b   :  { %v94_v18 = vmul.f32 %v173_v5, %v93_v13 }
  0x1c   :  { %v80_v20 = vadd.f32 %v171_v4, %v79_v16 }
  0x1d   :  { %v95_v23 = vadd.f32 %v173_v5, %v94_v18 }
  0x1e   :  { %v84_v24 = vsel %vm83_vm4, %v171_v4, %v80_v20 }
  0x1f   :  { %v89_v25 = vsel %vm86_vm5, %v88_v17, %v84_v24  ;;  %v99_v26 = vsel %vm98_vm6, %v173_v5, %v95_v23 }
  0x20   :  { %v90_v27 = vmul.f32 %v89_v25, %v72_v19  ;;  %v104_v28 = vsel %vm101_vm7, %v103_v21, %v99_v26 }
  0x21   :  { %v105_v29 = vmul.f32 %v104_v28, %v73_v22 }
  0x22   :  { %174 = vlog2.f32 %v90_v27 }
  0x23   :  { %176 = vlog2.f32 %v105_v29 }
  0x28   :  { %v175_v30 = vpop.eup %174 }
  0x29   :  { %v177_v31 = vpop.eup %176  ;;  %v107_v32 = vmul.f32 0.6931472, %v175_v30 }
  0x2a   :  { %v109_v33 = vmul.f32 0.6931472, %v177_v31 }
  0x2b   :  { %v110_v34 = vsub.f32 %v90_v27, %v107_v32 }
  0x2c   :  { %v111_v35 = vsub.f32 %v105_v29, %v109_v33 }
  0x2d   :  { %v163_v36 = vadd.f32 -1.0, %v110_v34 }
  0x2e   :  { %v164_v37 = vadd.f32 -1.0, %v111_v35 }
  0x2f   :  { %v123_v38 = vrot.slane %v163_v36, 4 }
  0x30   :  { %v129_v39 = vrot.slane %v164_v37, 4 }
  0x31   :  { %v124_v40 = vadd.f32 %v163_v36, %v123_v38 }
  0x32   :  { %v130_v41 = vadd.f32 %v164_v37, %v129_v39 }
  0x33   :  { %v125_v42 = vrot.slane %v124_v40, 2 }
  0x34   :  { %v131_v43 = vrot.slane %v130_v41, 2 }
  0x35   :  { %v126_v44 = vadd.f32 %v125_v42, %v124_v40 }
  0x36   :  { %v132_v45 = vadd.f32 %v131_v43, %v130_v41 }
  0x37   :  { %v127_v46 = vrot.slane %v126_v44, 1 }
  0x38   :  { %v133_v47 = vrot.slane %v132_v45, 1 }
  0x39   :  { %v128_v48 = vadd.f32 %v127_v46, %v126_v44 }
  0x3a   :  { %v134_v49 = vadd.f32 %v133_v47, %v132_v45 }
  0x3c   :  { %v138_v50 = vsel %vm137_vm8, %v134_v49, %v128_v48 }
  0x3d   :  { %140 = vst [vmem:[#allocation8] sm:$0x3] %v138_v50 }
  0x3e   :  { %151 = dma.vmem_to_hbm [thread:$0]  %s147_s1, 32, %s149_s23, [#allocation5]  }
  0x3f   :  { %254 = dma.done.wait [#allocation5], 32  }
  0x40   :  { %255 = vsyncadd [#allocation5], 4294967264 }
  0x41   :  { %156 = vsyncpa [#allocation4], 1 }
  0x42   :  { %157 = vsyncpa [#allocation7], 1 }
  0x43   :  { %158 = vsyncpa [#allocation5], 1 }

</bundles_post_ra>
